<compile_context>
chip_gen: v7x
topology: tpu7x:2x2x1
jax: 0.10.0
libtpu: 0.0.40
codegen_flags: <defaults>
</compile_context>

<pallas_src>
import math
from functools import partial

import jax
import jax.numpy as jnp
from jax.experimental import pallas as pl
from jax.experimental.pallas import tpu as pltpu

EPS = 1e-8  # matches F.layer_norm(..., 1e-08) in the reference module


# --------------------------------------------------------------------------- #
# Hardware-aware sizing helpers (all trace-time Python).
# --------------------------------------------------------------------------- #
def _sublane(itemsize):
    """Rows per packed sublane group: 8 for 4-byte, 16 for 2-byte, 32 for 1-byte."""
    return max(8, 32 // max(int(itemsize), 1))


def _is_dual_core_chip():
    """True on v7x-class parts (2 TensorCores per chip)."""
    try:
        kind = jax.devices()[0].device_kind.lower()
    except Exception:
        return False
    return "v7" in kind


def _vmem_caps(dual_core):
    """(vmem_limit_bytes, working budget) derived from the chip's VMEM capacity."""
    default_cap = (64 if dual_core else 128) * 1024 * 1024
    try:
        info = pltpu.get_tpu_info()
        cap = int(getattr(info, "vmem_capacity_bytes", 0)) or default_cap
    except Exception:
        cap = default_cap
    if dual_core:
        # Be conservative: never assume more than the 64 MiB per-TC VMEM of v7x.
        cap = min(cap, 64 * 1024 * 1024)
    return int(cap * 0.65), int(cap * 0.45)


def _pick_tile_rows(rows, hidden, itemsize, budget, dual_core):
    """Largest sublane-aligned row tile (<=512) whose buffers fit the VMEM budget."""
    sub = _sublane(itemsize)
    if rows < sub:
        return rows  # single full-extent block; no (8,128) constraint applies
    # Per tile row: 2x input + 2x output double-buffered in native dtype,
    # plus ~3 f32-sized in-kernel temporaries (centered copy, result, slack).
    bytes_per_row = hidden * (4 * itemsize + 3 * 4)
    t = int(budget // max(bytes_per_row, 1))
    t = max(min(t, 512), sub)           # roofline flattens at ~512-row tiles
    t = (t // sub) * sub                # sublane alignment for packed dtypes
    t = min(t, (rows // sub) * sub)     # keep the last block a partial block
    if dual_core and rows >= 4 * sub:
        # Aim for >= 4 grid steps (>= 2 per TensorCore) so megacore sharding
        # still leaves pipeline overlap per core.  Skip on single-TC chips.
        per_step = -(-rows // 4)
        per_step = max((per_step // sub) * sub, sub)
        t = min(t, per_step)
    return max(t, sub)


# --------------------------------------------------------------------------- #
# Kernels.
# --------------------------------------------------------------------------- #
def _normalize(x_ref, w_ref, *, hidden, tile_rows, rows, mask_rows):
    """Two-pass layernorm of the current (tile_rows, hidden) block; returns f32*weight."""
    inv_h = 1.0 / float(hidden)

    if mask_rows:
        row0 = pl.program_id(0) * tile_rows
        ridx = row0 + jax.lax.broadcasted_iota(jnp.int32, (tile_rows, 1), 0)
        valid = ridx < rows

    # Pass 1: mean.  Re-read/upcast per phase; no long-lived full-tile f32 copy.
    x0 = x_ref[...].astype(jnp.float32)
    if mask_rows:
        x0 = jnp.where(valid, x0, 0.0)  # drop garbage (possibly NaN) OOB rows
    mean = jnp.sum(x0, axis=-1, keepdims=True) * inv_h

    # Pass 2: centered sum of squares (numerically robust vs E[x^2]-mean^2).
    xc = x_ref[...].astype(jnp.float32) - mean
    if mask_rows:
        xc = jnp.where(valid, xc, 0.0)
    var = jnp.sum(xc * xc, axis=-1, keepdims=True) * inv_h
    inv = jax.lax.rsqrt(var + EPS)

    return xc * (inv * w_ref[...].astype(jnp.float32))


def _ln_kernel_bias(x_ref, w_ref, b_ref, o_ref, *, hidden, tile_rows, rows, mask_rows):
    y = _normalize(x_ref, w_ref, hidden=hidden, tile_rows=tile_rows,
                   rows=rows, mask_rows=mask_rows)
    y = y + b_ref[...].astype(jnp.float32)
    o_ref[...] = y.astype(o_ref.dtype)


def _ln_kernel_nobias(x_ref, w_ref, o_ref, *, hidden, tile_rows, rows, mask_rows):
    y = _normalize(x_ref, w_ref, hidden=hidden, tile_rows=tile_rows,
                   rows=rows, mask_rows=mask_rows)
    o_ref[...] = y.astype(o_ref.dtype)


# --------------------------------------------------------------------------- #
# Wrapper.
# --------------------------------------------------------------------------- #
@jax.jit
def layer_norm(x, weight, bias=None):
    """LayerNorm over the last axis of x with eps=1e-8, optional bias (nanoGPT semantics)."""
    orig_shape = x.shape
    hidden = orig_shape[-1]
    rows = int(math.prod(orig_shape[:-1])) if len(orig_shape) > 1 else 1
    x2 = x.reshape(rows, hidden)

    dual_core = _is_dual_core_chip()
    vmem_limit, budget = _vmem_caps(dual_core)
    itemsize = jnp.dtype(x.dtype).itemsize
    tile_rows = _pick_tile_rows(rows, hidden, itemsize, budget, dual_core)
    grid_rows = pl.cdiv(rows, tile_rows)
    mask_rows = (rows % tile_rows) != 0  # partial last block -> in-kernel row mask

    w2 = weight.reshape(1, hidden)

    row_spec = pl.BlockSpec((tile_rows, hidden), lambda i: (i, 0))
    vec_spec = pl.BlockSpec((1, hidden), lambda i: (0, 0))

    static = dict(hidden=hidden, tile_rows=tile_rows, rows=rows, mask_rows=mask_rows)
    if bias is not None:
        kernel = partial(_ln_kernel_bias, **static)
        in_specs = [row_spec, vec_spec, vec_spec]
        args = (x2, w2, bias.reshape(1, hidden))
    else:
        kernel = partial(_ln_kernel_nobias, **static)
        in_specs = [row_spec, vec_spec]
        args = (x2, w2)

    out2 = pl.pallas_call(
        kernel,
        out_shape=jax.ShapeDtypeStruct((rows, hidden), x.dtype),
        grid_spec=pltpu.PrefetchScalarGridSpec(
            num_scalar_prefetch=0,
            grid=(grid_rows,),
            in_specs=in_specs,
            out_specs=row_spec,
        ),
        compiler_params=pltpu.CompilerParams(
            dimension_semantics=("parallel",),
            vmem_limit_bytes=vmem_limit,
        ),
    )(*args)

    return out2.reshape(orig_shape)


# --------------------------------------------------------------------------- #
# Reference + demo.
# --------------------------------------------------------------------------- #
def _ref_layer_norm(x, weight, bias=None):
    mean = jnp.mean(x, axis=-1, keepdims=True)
    var = jnp.mean((x - mean) ** 2, axis=-1, keepdims=True)
    y = (x - mean) / jnp.sqrt(var + EPS) * weight
    if bias is not None:
        y = y + bias
    return y


if __name__ == "__main__":
    key = jax.random.PRNGKey(0)
    batch, seq, hidden = 2, 8, 32

    # Parameters exactly as in the module __init__: weight=ones, bias=zeros.
    weight = jnp.ones((hidden,), dtype=jnp.float32)
    bias = jnp.zeros((hidden,), dtype=jnp.float32)  # bias=True case

    x = jax.random.normal(key, (batch, seq, hidden), dtype=jnp.float32)

    out = jax.block_until_ready(layer_norm(x, weight, bias))
    ref = _ref_layer_norm(x, weight, bias)
    assert jnp.allclose(out, ref, atol=1e-5, rtol=1e-5), "mismatch vs reference (bias)"

    # bias=False path (module with bias=None).
    out_nb = jax.block_until_ready(layer_norm(x, weight, None))
    ref_nb = _ref_layer_norm(x, weight, None)
    assert jnp.allclose(out_nb, ref_nb, atol=1e-5, rtol=1e-5), "mismatch (no bias)"

    # Non-tile-aligned row count (rows = 15) exercises the in-kernel row mask
    # (no wrapper-side pad / slice HBM copies).
    key2 = jax.random.PRNGKey(1)
    x_odd = jax.random.normal(key2, (3, 5, hidden), dtype=jnp.float32)
    out_odd = jax.block_until_ready(layer_norm(x_odd, weight, bias))
    ref_odd = _ref_layer_norm(x_odd, weight, bias)
    assert jnp.allclose(out_odd, ref_odd, atol=1e-5, rtol=1e-5), "mismatch (ragged rows)"

    # Shifted-mean data checks the two-pass variance on non-N(0,1) scales.
    x_shift = x * 0.05 + 100.0
    out_sh = jax.block_until_ready(layer_norm(x_shift, weight, bias))
    ref_sh = _ref_layer_norm(x_shift, weight, bias)
    assert jnp.allclose(out_sh, ref_sh, atol=1e-4, rtol=1e-4), "mismatch (shifted mean)"

    print("KERNEL_OK")
</pallas_src>

<mosaic_0001>
module attributes {stable_mosaic.version = 11 : i64} {
  func.func @_ln_kernel_bias(%arg0: i32, %arg1: memref<16x32xf32, #tpu.memory_space<vmem>>, %arg2: memref<1x32xf32, #tpu.memory_space<vmem>>, %arg3: memref<1x32xf32, #tpu.memory_space<vmem>>, %arg4: memref<16x32xf32, #tpu.memory_space<vmem>>) attributes {dimension_semantics = [#tpu.dimension_semantics<parallel>], iteration_bounds = array<i64: 1>, scalar_prefetch = 0 : i64, scratch_operands = 0 : i64, tpu.core_type = #tpu.core_type<tc>, window_params = [{transform_indices = @transform_0, window_bounds = array<i64: 16, 32>}, {pipeline_mode = #tpu.pipeline_mode<synchronous>, transform_indices = @transform_1, window_bounds = array<i64: 1, 32>}, {pipeline_mode = #tpu.pipeline_mode<synchronous>, transform_indices = @transform_2, window_bounds = array<i64: 1, 32>}, {transform_indices = @transform_3, window_bounds = array<i64: 16, 32>}]} {
    %c0 = arith.constant 0 : index
    %c0_0 = arith.constant 0 : index
    %0 = vector.load %arg1[%c0, %c0_0] : memref<16x32xf32, #tpu.memory_space<vmem>>, vector<16x32xf32>
    %cst = arith.constant dense<0.000000e+00> : vector<16xf32>
    %1 = vector.multi_reduction <add>, %0, %cst [1] : vector<16x32xf32> to vector<16xf32>
    %2 = vector.shape_cast %1 : vector<16xf32> to vector<16x1xf32>
    %cst_1 = arith.constant 3.125000e-02 : f32
    %3 = vector.broadcast %cst_1 : f32 to vector<16x1xf32>
    %4 = arith.mulf %2, %3 : vector<16x1xf32>
    %c0_2 = arith.constant 0 : index
    %c0_3 = arith.constant 0 : index
    %5 = vector.load %arg1[%c0_2, %c0_3] : memref<16x32xf32, #tpu.memory_space<vmem>>, vector<16x32xf32>
    %6 = vector.broadcast %4 : vector<16x1xf32> to vector<16x32xf32>
    %7 = arith.subf %5, %6 : vector<16x32xf32>
    %8 = arith.mulf %7, %7 : vector<16x32xf32>
    %cst_4 = arith.constant dense<0.000000e+00> : vector<16xf32>
    %9 = vector.multi_reduction <add>, %8, %cst_4 [1] : vector<16x32xf32> to vector<16xf32>
    %10 = vector.shape_cast %9 : vector<16xf32> to vector<16x1xf32>
    %cst_5 = arith.constant 3.125000e-02 : f32
    %11 = vector.broadcast %cst_5 : f32 to vector<16x1xf32>
    %12 = arith.mulf %10, %11 : vector<16x1xf32>
    %cst_6 = arith.constant 9.99999993E-9 : f32
    %13 = vector.broadcast %cst_6 : f32 to vector<16x1xf32>
    %14 = arith.addf %12, %13 : vector<16x1xf32>
    %15 = math.rsqrt %14 : vector<16x1xf32>
    %c0_7 = arith.constant 0 : index
    %c0_8 = arith.constant 0 : index
    %16 = vector.load %arg2[%c0_7, %c0_8] : memref<1x32xf32, #tpu.memory_space<vmem>>, vector<1x32xf32>
    %17 = vector.broadcast %15 : vector<16x1xf32> to vector<16x32xf32>
    %18 = vector.broadcast %16 : vector<1x32xf32> to vector<16x32xf32>
    %19 = arith.mulf %17, %18 : vector<16x32xf32>
    %20 = arith.mulf %7, %19 : vector<16x32xf32>
    %c0_9 = arith.constant 0 : index
    %c0_10 = arith.constant 0 : index
    %21 = vector.load %arg3[%c0_9, %c0_10] : memref<1x32xf32, #tpu.memory_space<vmem>>, vector<1x32xf32>
    %22 = vector.broadcast %21 : vector<1x32xf32> to vector<16x32xf32>
    %23 = arith.addf %20, %22 : vector<16x32xf32>
    %c0_11 = arith.constant 0 : index
    %c0_12 = arith.constant 0 : index
    %24 = vector.load %arg4[%c0_11, %c0_12] : memref<16x32xf32, #tpu.memory_space<vmem>>, vector<16x32xf32>
    tpu.vector_store %arg4[%c0_11, %c0_12], %23 {strides = array<i32>} : memref<16x32xf32, #tpu.memory_space<vmem>>, vector<16x32xf32>,
    return
  }
  func.func @transform_0(%arg0: i32) -> (i32, i32) {
    %c0_i32 = arith.constant 0 : i32
    %c0_i32_0 = arith.constant 0 : i32
    return %arg0, %c0_i32 : i32, i32
  }
  func.func @transform_1(%arg0: i32) -> (i32, i32) {
    %c0_i32 = arith.constant 0 : i32
    %c0_i32_0 = arith.constant 0 : i32
    %c0_i32_1 = arith.constant 0 : i32
    return %c0_i32, %c0_i32_0 : i32, i32
  }
  func.func @transform_2(%arg0: i32) -> (i32, i32) {
    %c0_i32 = arith.constant 0 : i32
    %c0_i32_0 = arith.constant 0 : i32
    %c0_i32_1 = arith.constant 0 : i32
    return %c0_i32, %c0_i32_0 : i32, i32
  }
  func.func @transform_3(%arg0: i32) -> (i32, i32) {
    %c0_i32 = arith.constant 0 : i32
    %c0_i32_0 = arith.constant 0 : i32
    return %arg0, %c0_i32 : i32, i32
  }
}

</mosaic_0001>

<bundles_post_ra>
// kernel: layer_norm.1
= control target key start
LH: loop header
LB: loop body
LE: loop exit
PB: predicated region body
PF: predicated region fallthrough
CT: control target
= control target key end

     0   :  { %8 = vsyncpa [#allocation3], 0  ;;  %s318_s0 = inlined_call_operand.hbm [shape: f32[16,32], index: 0, kind: input, shape index: {}]   ;;  %s319_s1 = inlined_call_operand.hbm [shape: f32[1,32], index: 1, kind: input, shape index: {}]   ;;  %s320_s2 = inlined_call_operand.hbm [shape: f32[1,32], index: 2, kind: input, shape index: {}]   ;;  %s321_s3 = inlined_call_operand.hbm [shape: f32[16,32], index: 3, kind: output, shape index: {}]  }
   0x1   :  { %9 = vsyncpa [#allocation6], 0 }
   0x2   :  { %10 = vsyncpa [#allocation4], 0  ;;  %s225_s12 = smov [#allocation5]   ;;  %s226_s14 = smov [#allocation2]  }
   0x3   :  { %s29_s13 = sshll.u32 %s225_s12, 4  ;;  %s16_s15 = sshll.u32 %s226_s14, 4  ;;  %s30_s13 = int_to_ptr.vmem [resolvable:$true] %s29_s13  ;;  %s251_s15 = int_to_ptr.vmem [resolvable:$true] %s16_s15 }
   0x4   :  { %s131_s18 = scalar_lea.hbm %s319_s1, 16 }
   0x5   :  { %p132_p0 = scmp.ne.s32.totalorder %s319_s1, %s131_s18  ;;  %p135_p1 = scmp.lt.u32.totalorder %s131_s18, %s319_s1 }
   0x7   :  { %p137_p2 = pnand %p135_p1, %p132_p0 }
   0x9   :  { %140 = shalt.err (!%p137_p2)
}
   0xa   :  { %s141_s23 = scalar_lea.vmem %s30_s13, 16  ;;  %s145_s24 = scalar_lea.vmem %s30_s13, 32 }
   0xb   :  { %p142_p3 = scmp.ne.s32.totalorder %s30_s13, %s141_s23  ;;  %p146_p4 = scmp.lt.s32.totalorder %s30_s13, %s30_s13 }
   0xc   :  { %p147_p5 = scmp.lt.s32.totalorder %s145_s24, %s141_s23 }
   0xe   :  { %p148_p6 = por %p147_p5, %p146_p4 }
  0x10   :  { %p149_p7 = pnand %p148_p6, %p142_p3 }
  0x12   :  { %152 = shalt.err (!%p149_p7)
}
  0x13   :  { %32 = dma.hbm_to_vmem [thread:$0]  %s319_s1, 16, %s30_s13, [#allocation6]  }
  0x14   :  { %s153_s29 = scalar_lea.hbm %s318_s0, 256 }
  0x15   :  { %p154_p8 = scmp.ne.s32.totalorder %s318_s0, %s153_s29  ;;  %p157_p9 = scmp.lt.u32.totalorder %s153_s29, %s318_s0 }
  0x17   :  { %p159_p10 = pnand %p157_p9, %p154_p8 }
  0x19   :  { %162 = shalt.err (!%p159_p10)
}
  0x1a   :  { %s163_s7 = scalar_lea.vmem %s251_s15, 256  ;;  %p168_p12 = scmp.lt.s32.totalorder %s251_s15, %s251_s15 }
  0x1b   :  { %p164_p11 = scmp.ne.s32.totalorder %s251_s15, %s163_s7  ;;  %p169_p13 = scmp.lt.s32.totalorder %s163_s7, %s163_s7 }
  0x1d   :  { %p170_p0 = por %p169_p13, %p168_p12 }
  0x1f   :  { %p171_p1 = pnand %p170_p0, %p164_p11 }
  0x21   :  { %174 = shalt.err (!%p171_p1)
}
  0x22   :  { %s227_s1 = smov 128   ;;  %s228_s8 = smov 8  }
  0x23   :  { %22 = dma.hbm_to_vmem [thread:$0]  %s318_s0, 256, %s251_s15, [#allocation3], %s227_s1, %s227_s1, %s228_s8  }
  0x24   :  { %s229_s11 = smov [#allocation7]   ;;  %s175_s16 = scalar_lea.hbm %s320_s2, 16 }
  0x25   :  { %s39_s12 = sshll.u32 %s229_s11, 4  ;;  %p176_p2 = scmp.ne.s32.totalorder %s320_s2, %s175_s16  ;;  %s40_s12 = int_to_ptr.vmem [resolvable:$true] %s39_s12 }
  0x26   :  { %p179_p3 = scmp.lt.u32.totalorder %s175_s16, %s320_s2 }
  0x28   :  { %p181_p4 = pnand %p179_p3, %p176_p2 }
  0x2a   :  { %184 = shalt.err (!%p181_p4)
}
  0x2b   :  { %s185_s21 = scalar_lea.vmem %s40_s12, 16  ;;  %s189_s0 = scalar_lea.vmem %s40_s12, 32 }
  0x2c   :  { %p186_p5 = scmp.ne.s32.totalorder %s40_s12, %s185_s21  ;;  %p190_p6 = scmp.lt.s32.totalorder %s40_s12, %s40_s12 }
  0x2d   :  { %p191_p7 = scmp.lt.s32.totalorder %s189_s0, %s185_s21 }
  0x2f   :  { %p192_p8 = por %p191_p7, %p190_p6 }
  0x31   :  { %p193_p9 = pnand %p192_p8, %p186_p5 }
  0x33   :  { %196 = shalt.err (!%p193_p9)
}
  0x34   :  { %42 = dma.hbm_to_vmem [thread:$0]  %s320_s2, 16, %s40_s12, [#allocation6]  }
  0x35   :  { %219 = dma.done.wait [#allocation3], 256  }
  0x36   :  { %220 = vsyncadd [#allocation3], 4294967040 }
  0x37   :  { %221 = dma.done.wait [#allocation6], 32  }
  0x38   :  { %222 = vsyncadd [#allocation6], 4294967264  ;;  %vm54_vm0 = vcmask 261120   ;;  %v52_v0 = vld [vmem:[#allocation2] sm:$0xff]  ;;  %v53_v1 = vld [vmem:[#allocation2 + $0x8] sm:$0xff]  ;;  %s230_s2 = smov [#allocation8]  }
  0x39   :  { %v55_v2 = vsel %vm54_vm0, %v52_v0, 0.0  ;;  %v58_v3 = vsel %vm54_vm0, %v53_v1, 0.0  ;;  %v119_v20 = vld [vmem:[#allocation5] ss:$0 sm:$0xff]  ;;  %v120_v23 = vld [vmem:[#allocation7] ss:$0 sm:$0xff] }
  0x3a   :  { %56 = vadd.xlane.f32.xlu0 %v55_v2  ;;  %s106_s23 = sshll.u32 %s230_s2, 4  ;;  %s107_s23 = int_to_ptr.vmem [resolvable:$true] %s106_s23 }
  0x3b   :  { %s197_s24 = scalar_lea.vmem %s107_s23, 256  ;;  %p202_p11 = scmp.lt.s32.totalorder %s107_s23, %s107_s23 }
  0x3c   :  { %p198_p10 = scmp.ne.s32.totalorder %s107_s23, %s197_s24  ;;  %p203_p12 = scmp.lt.s32.totalorder %s197_s24, %s197_s24 }
  0x3e   :  { %59 = vadd.xlane.f32.xlu0 %v58_v3  ;;  %p204_p13 = por %p203_p12, %p202_p11 }
  0x40   :  { %p205_p0 = pnand %p204_p13, %p198_p10 }
  0xc7   :  { %v57_v4 = vpop.xlane.xlu0 %56 }
  0xc8   :  { %v61_v5 = vmul.f32 0.03125, %v57_v4 }
  0xca   :  { %v63_v6 = vsub.f32 %v52_v0, %v61_v5 }
  0xcb   :  { %v60_v7 = vpop.xlane.xlu0 %59 }
  0xcc   :  { %v62_v8 = vmul.f32 0.03125, %v60_v7  ;;  %v65_v9 = vmul.f32 %v63_v6, %v63_v6 }
  0xce   :  { %v64_v10 = vsub.f32 %v53_v1, %v62_v8  ;;  %v67_v11 = vsel %vm54_vm0, %v65_v9, 0.0 }
  0xcf   :  { %68 = vadd.xlane.f32.xlu1 %v67_v11 }
  0xd0   :  { %v66_v12 = vmul.f32 %v64_v10, %v64_v10 }
  0xd2   :  { %v70_v13 = vsel %vm54_vm0, %v66_v12, 0.0 }
  0xd3   :  { %71 = vadd.xlane.f32.xlu1 %v70_v13 }
 0x15c   :  { %v69_v14 = vpop.xlane.xlu1 %68 }
 0x15d   :  { %v73_v15 = vmul.f32 0.03125, %v69_v14 }
 0x15f   :  { %v75_v16 = vadd.f32 1e-08, %v73_v15 }
 0x160   :  { %v72_v17 = vpop.xlane.xlu1 %71 }
 0x161   :  { %127 = vrsqrt.f32 %v75_v16  ;;  %v74_v18 = vmul.f32 0.03125, %v72_v17 }
 0x163   :  { %v76_v19 = vadd.f32 1e-08, %v74_v18 }
 0x165   :  { %129 = vrsqrt.f32 %v76_v19 }
 0x16b   :  { %v128_v21 = vpop.eup %127 }
 0x16c   :  { %v86_v22 = vmul.f32 %v128_v21, %v119_v20 }
 0x16e   :  { %v88_v24 = vmul.f32 %v86_v22, %v63_v6 }
 0x16f   :  { %v130_v25 = vpop.eup %129 }
 0x170   :  { %v87_v26 = vmul.f32 %v130_v25, %v119_v20  ;;  %v97_v27 = vadd.f32 %v120_v23, %v88_v24 }
 0x172   :  { %v89_v28 = vmul.f32 %v87_v26, %v64_v10  ;;  %99 = vst.msk [vmem:[#allocation8] sm:$0xff] %vm54_vm0, %v97_v27 }
 0x174   :  { %v98_v29 = vadd.f32 %v120_v23, %v89_v28 }
 0x176   :  { %100 = vst.msk [vmem:[#allocation8 + $0x8] sm:$0xff] %vm54_vm0, %v98_v29 }
 0x177   :  { %208 = shalt.err (!%p205_p0)
}
 0x178   :  { %s209_s27 = scalar_lea.hbm %s321_s3, 256 }
 0x179   :  { %p210_p1 = scmp.ne.s32.totalorder %s321_s3, %s209_s27  ;;  %p213_p2 = scmp.lt.u32.totalorder %s209_s27, %s321_s3 }
 0x17b   :  { %p215_p3 = pnand %p213_p2, %p210_p1 }
 0x17d   :  { %218 = shalt.err (!%p215_p3)
}
 0x17e   :  { %112 = dma.vmem_to_hbm [thread:$0]  %s107_s23, 256, %s321_s3, [#allocation4], %s227_s1, %s227_s1, %s228_s8  }
 0x17f   :  { %223 = dma.done.wait [#allocation4], 256  }
 0x180   :  { %224 = vsyncadd [#allocation4], 4294967040 }
 0x181   :  { %116 = vsyncpa [#allocation3], 1 }
 0x182   :  { %117 = vsyncpa [#allocation6], 1 }
 0x183   :  { %118 = vsyncpa [#allocation4], 1 }

</bundles_post_ra>
